<compile_context>
chip_gen: v7x
topology: tpu7x:2x2x1
jax: 0.10.0
libtpu: 0.0.40
codegen_flags: <defaults>
</compile_context>

<pallas_src>
import jax
import jax.numpy as jnp
from jax import lax
from jax.experimental import pallas as pl
from jax.experimental.pallas import tpu as pltpu


def _round_up(n, m):
    return ((n + m - 1) // m) * m


def _choose_tile(B, block_batch):
    """Batch-tile (lane) size: multiple of 128, >=2 grid steps for large B."""
    if B <= block_batch:
        return _round_up(max(B, 1), 128)
    half = _round_up((B + 1) // 2, 128)
    return min(block_batch, half)


def _cnn_viterbinet_kernel(x_ref,
                           w1a_ref, w1b_ref, b1_ref,
                           w2_ref, b2_ref,
                           w3_ref, b3_ref,
                           wfc_ref, bfc_ref,
                           o_ref):
    # Activations are (channels, batch_tile): channels on sublanes, batch on
    # lanes (bm is a multiple of 128 -> everything is lane-dense).
    x = x_ref[...]                                            # (1, bm) f32

    # Stage 1: Conv1d(1->32) + ReLU + MaxPool.  Contraction dim is 1, so the
    # two pooled taps are broadcast multiplies; pool = elementwise max.
    s1 = jnp.maximum(w1a_ref[...] * x, w1b_ref[...] * x)      # (32, bm)
    h1 = jnp.maximum(s1 + b1_ref[...], 0.0)                   # (32, bm)

    # Stage 2: Conv1d(32->64) + ReLU + MaxPool.  Both taps fused in one
    # (128,32)@(32,bm) matmul; tap-max = sublane-aligned split (free).
    s2 = jnp.dot(w2_ref[...], h1.astype(jnp.bfloat16),
                 preferred_element_type=jnp.float32)          # (128, bm)
    h2 = jnp.maximum(jnp.maximum(s2[:64], s2[64:]) + b2_ref[...], 0.0)   # (64, bm)

    # Stage 3: Conv1d(64->128) + ReLU + MaxPool.  (256,64)@(64,bm) matmul.
    s3 = jnp.dot(w3_ref[...], h2.astype(jnp.bfloat16),
                 preferred_element_type=jnp.float32)          # (256, bm)
    h3 = jnp.maximum(jnp.maximum(s3[:128], s3[128:]) + b3_ref[...], 0.0)  # (128, bm)

    # fc(128 -> 16) + sigmoid.  Output (16, bm) is fully lane-dense, so the
    # exp / reciprocal / store all run on dense vregs.
    logits = jnp.dot(wfc_ref[...], h3.astype(jnp.bfloat16),
                     preferred_element_type=jnp.float32) + bfc_ref[...]   # (16, bm)
    # Sign-stable sigmoid: exp(-|z|) never overflows.
    e = jnp.exp(-jnp.abs(logits))
    p = pl.reciprocal(1.0 + e, approx=True)                   # sigmoid(|z|)
    o_ref[...] = jnp.where(logits >= 0.0, p, 1.0 - p)


def prepare_weights(params):
    """One-time fusion of the PyTorch params into kernel-ready operands.

    Pool keeps conv outputs t=0 (kernel tap 4) and t=1 (kernel tap 3).
    Weights are laid out (out_ch, in_ch) so they left-multiply the
    channels-on-sublanes activations; matmul weights are bf16.
    """
    W1, b1, W2, b2, W3, b3, Wfc, bfc = params
    w1a = W1[:, :, 4].astype(jnp.float32)                     # (32, 1)
    w1b = W1[:, :, 3].astype(jnp.float32)                     # (32, 1)
    w2f = jnp.concatenate([W2[:, :, 4], W2[:, :, 3]], axis=0).astype(jnp.bfloat16)  # (128, 32)
    w3f = jnp.concatenate([W3[:, :, 4], W3[:, :, 3]], axis=0).astype(jnp.bfloat16)  # (256, 64)
    wfc = Wfc.astype(jnp.bfloat16)                            # (16, 128)
    b1c = b1.reshape(-1, 1).astype(jnp.float32)               # (32, 1)
    b2c = b2.reshape(-1, 1).astype(jnp.float32)               # (64, 1)
    b3c = b3.reshape(-1, 1).astype(jnp.float32)               # (128, 1)
    bfcc = bfc.reshape(-1, 1).astype(jnp.float32)             # (16, 1)
    return (w1a, w1b, b1c, w2f, b2c, w3f, b3c, wfc, bfcc)


def cnn_viterbinet_forward(x, fused_weights, block_batch=4096):
    """x: (B, 1) float32 -> (B, 16) float32 (matches the torch forward).

    block_batch: rows per grid step (lane-axis tile).  4096 amortizes the
    ~0.35us per-grid-step overhead; the tile chooser keeps >=2 grid steps for
    large B so both v7x TensorCores get work.
    """
    B = x.shape[0]
    bm = _choose_tile(B, block_batch)
    B_pad = _round_up(B, bm)

    # Batch on the lane (last) axis.
    xt = x.reshape(1, B).astype(jnp.float32)
    if B_pad != B:
        xt = jnp.pad(xt, ((0, 0), (0, B_pad - B)))

    def full_spec(a):
        return pl.BlockSpec(a.shape, lambda i: (0,) * a.ndim)

    grid = (B_pad // bm,)
    in_specs = [pl.BlockSpec((1, bm), lambda i: (0, i))] + \
               [full_spec(w) for w in fused_weights]
    out_spec = pl.BlockSpec((16, bm), lambda i: (0, i))

    out = pl.pallas_call(
        _cnn_viterbinet_kernel,
        out_shape=jax.ShapeDtypeStruct((16, B_pad), jnp.float32),
        grid=grid,
        in_specs=in_specs,
        out_specs=out_spec,
        compiler_params=pltpu.CompilerParams(
            dimension_semantics=("parallel",),
            vmem_limit_bytes=48 * 1024 * 1024),
    )(xt, *fused_weights)

    return out[:, :B].T                                       # (B, 16)


def make_params(key):
    """Deterministic parameter init (shapes from CnnViterbiNet.__init__)."""
    ks = jax.random.split(key, 8)
    W1 = jax.random.normal(ks[0], (32, 1, 7), jnp.float32) * 0.3
    b1 = jax.random.normal(ks[1], (32,), jnp.float32) * 0.1
    W2 = jax.random.normal(ks[2], (64, 32, 7), jnp.float32) * 0.1
    b2 = jax.random.normal(ks[3], (64,), jnp.float32) * 0.1
    W3 = jax.random.normal(ks[4], (128, 64, 7), jnp.float32) * 0.1
    b3 = jax.random.normal(ks[5], (128,), jnp.float32) * 0.1
    Wfc = jax.random.normal(ks[6], (16, 128), jnp.float32) * 0.1
    bfc = jax.random.normal(ks[7], (16,), jnp.float32) * 0.1
    return (W1, b1, W2, b2, W3, b3, Wfc, bfc)


def reference_forward(x, params):
    """Pure-JAX replica of the PyTorch forward (NCL conv / relu / maxpool)."""
    W1, b1, W2, b2, W3, b3, Wfc, bfc = params
    v = x[:, None, :]                                         # (B, 1, 1)  NCL
    for W, b in ((W1, b1), (W2, b2), (W3, b3)):
        v = lax.conv_general_dilated(
            v, W, window_strides=(1,), padding=[(4, 4)],
            dimension_numbers=("NCH", "OIH", "NCH")) + b[None, :, None]
        v = jnp.maximum(v, 0.0)
        v = lax.reduce_window(v, -jnp.inf, lax.max,
                              (1, 1, 2), (1, 1, 2), "VALID")
    v = v[:, :, 0]                                            # (B, 128)
    return jax.nn.sigmoid(v @ Wfc.T + bfc)


if __name__ == "__main__":
    key = jax.random.PRNGKey(0)
    kp, kx = jax.random.split(key)
    params = make_params(kp)
    fused = prepare_weights(params)

    # Small batch, deliberately NOT a multiple of 128, to exercise the
    # pad-to-tile + slice path.
    B = 19
    x = jax.random.normal(kx, (B, 1), jnp.float32)            # channel samples
    out = jax.block_until_ready(cnn_viterbinet_forward(x, fused))
    ref = jax.block_until_ready(reference_forward(x, params))
    assert out.shape == (B, 16)
    # bf16 matmul operands + approx reciprocal -> loosened tolerance.
    assert jnp.allclose(out, ref, atol=2e-2, rtol=2e-2), (
        f"max err {jnp.max(jnp.abs(out - ref))}")

    # Second small case exercising a multi-step (grid=2) pipeline.
    B2 = 200
    x2 = jax.random.normal(jax.random.PRNGKey(1), (B2, 1), jnp.float32)
    out2 = jax.block_until_ready(
        cnn_viterbinet_forward(x2, fused, block_batch=128))
    ref2 = jax.block_until_ready(reference_forward(x2, params))
    assert out2.shape == (B2, 16)
    assert jnp.allclose(out2, ref2, atol=2e-2, rtol=2e-2), (
        f"max err {jnp.max(jnp.abs(out2 - ref2))}")

    print("KERNEL_OK")
</pallas_src>

<mosaic_0001>
module attributes {stable_mosaic.version = 11 : i64} {
  func.func @_cnn_viterbinet_kernel(%arg0: i32, %arg1: memref<1x128xf32, #tpu.memory_space<vmem>>, %arg2: memref<32x1xf32, #tpu.memory_space<vmem>>, %arg3: memref<32x1xf32, #tpu.memory_space<vmem>>, %arg4: memref<32x1xf32, #tpu.memory_space<vmem>>, %arg5: memref<128x32xbf16, #tpu.memory_space<vmem>>, %arg6: memref<64x1xf32, #tpu.memory_space<vmem>>, %arg7: memref<256x64xbf16, #tpu.memory_space<vmem>>, %arg8: memref<128x1xf32, #tpu.memory_space<vmem>>, %arg9: memref<16x128xbf16, #tpu.memory_space<vmem>>, %arg10: memref<16x1xf32, #tpu.memory_space<vmem>>, %arg11: memref<16x128xf32, #tpu.memory_space<vmem>>) attributes {dimension_semantics = [#tpu.dimension_semantics<parallel>], iteration_bounds = array<i64: 1>, scalar_prefetch = 0 : i64, scratch_operands = 0 : i64, tpu.core_type = #tpu.core_type<tc>, window_params = [{transform_indices = @transform_0, window_bounds = array<i64: 1, 128>}, {pipeline_mode = #tpu.pipeline_mode<synchronous>, transform_indices = @transform_1, window_bounds = array<i64: 32, 1>}, {pipeline_mode = #tpu.pipeline_mode<synchronous>, transform_indices = @transform_2, window_bounds = array<i64: 32, 1>}, {pipeline_mode = #tpu.pipeline_mode<synchronous>, transform_indices = @transform_3, window_bounds = array<i64: 32, 1>}, {pipeline_mode = #tpu.pipeline_mode<synchronous>, transform_indices = @transform_4, window_bounds = array<i64: 128, 32>}, {pipeline_mode = #tpu.pipeline_mode<synchronous>, transform_indices = @transform_5, window_bounds = array<i64: 64, 1>}, {pipeline_mode = #tpu.pipeline_mode<synchronous>, transform_indices = @transform_6, window_bounds = array<i64: 256, 64>}, {pipeline_mode = #tpu.pipeline_mode<synchronous>, transform_indices = @transform_7, window_bounds = array<i64: 128, 1>}, {pipeline_mode = #tpu.pipeline_mode<synchronous>, transform_indices = @transform_8, window_bounds = array<i64: 16, 128>}, {pipeline_mode = #tpu.pipeline_mode<synchronous>, transform_indices = @transform_9, window_bounds = array<i64: 16, 1>}, {transform_indices = @transform_10, window_bounds = array<i64: 16, 128>}]} {
    %c0 = arith.constant 0 : index
    %c0_0 = arith.constant 0 : index
    %0 = vector.load %arg1[%c0, %c0_0] : memref<1x128xf32, #tpu.memory_space<vmem>>, vector<1x128xf32>
    %c0_1 = arith.constant 0 : index
    %c0_2 = arith.constant 0 : index
    %1 = vector.load %arg2[%c0_1, %c0_2] : memref<32x1xf32, #tpu.memory_space<vmem>>, vector<32x1xf32>
    %2 = vector.broadcast %1 : vector<32x1xf32> to vector<32x128xf32>
    %3 = vector.broadcast %0 : vector<1x128xf32> to vector<32x128xf32>
    %4 = arith.mulf %2, %3 : vector<32x128xf32>
    %c0_3 = arith.constant 0 : index
    %c0_4 = arith.constant 0 : index
    %5 = vector.load %arg3[%c0_3, %c0_4] : memref<32x1xf32, #tpu.memory_space<vmem>>, vector<32x1xf32>
    %6 = vector.broadcast %5 : vector<32x1xf32> to vector<32x128xf32>
    %7 = vector.broadcast %0 : vector<1x128xf32> to vector<32x128xf32>
    %8 = arith.mulf %6, %7 : vector<32x128xf32>
    %9 = arith.maximumf %4, %8 : vector<32x128xf32>
    %c0_5 = arith.constant 0 : index
    %c0_6 = arith.constant 0 : index
    %10 = vector.load %arg4[%c0_5, %c0_6] : memref<32x1xf32, #tpu.memory_space<vmem>>, vector<32x1xf32>
    %11 = vector.broadcast %10 : vector<32x1xf32> to vector<32x128xf32>
    %12 = arith.addf %9, %11 : vector<32x128xf32>
    %cst = arith.constant 0.000000e+00 : f32
    %13 = vector.broadcast %cst : f32 to vector<32x128xf32>
    %14 = arith.maximumf %12, %13 : vector<32x128xf32>
    %c0_7 = arith.constant 0 : index
    %c0_8 = arith.constant 0 : index
    %15 = vector.load %arg5[%c0_7, %c0_8] : memref<128x32xbf16, #tpu.memory_space<vmem>>, vector<128x32xbf16>
    %16 = arith.truncf %14 : vector<32x128xf32> to vector<32x128xbf16>
    %cst_9 = arith.constant dense<0.000000e+00> : vector<128x128xf32>
    %17 = tpu.matmul %15, %16, %cst_9 {dimension_numbers = #tpu.dot_dimension_numbers<[1], [0], [0], [1], [0, 0, 1, 1], [], []>} : vector<128x32xbf16>, vector<32x128xbf16>, vector<128x128xf32> -> vector<128x128xf32>
    %18 = vector.extract_strided_slice %17 {offsets = [0, 0], sizes = [64, 128], strides = [1, 1]} : vector<128x128xf32> to vector<64x128xf32>
    %19 = vector.extract_strided_slice %17 {offsets = [64, 0], sizes = [64, 128], strides = [1, 1]} : vector<128x128xf32> to vector<64x128xf32>
    %20 = arith.maximumf %18, %19 : vector<64x128xf32>
    %c0_10 = arith.constant 0 : index
    %c0_11 = arith.constant 0 : index
    %21 = vector.load %arg6[%c0_10, %c0_11] : memref<64x1xf32, #tpu.memory_space<vmem>>, vector<64x1xf32>
    %22 = vector.broadcast %21 : vector<64x1xf32> to vector<64x128xf32>
    %23 = arith.addf %20, %22 : vector<64x128xf32>
    %cst_12 = arith.constant 0.000000e+00 : f32
    %24 = vector.broadcast %cst_12 : f32 to vector<64x128xf32>
    %25 = arith.maximumf %23, %24 : vector<64x128xf32>
    %c0_13 = arith.constant 0 : index
    %c0_14 = arith.constant 0 : index
    %26 = vector.load %arg7[%c0_13, %c0_14] : memref<256x64xbf16, #tpu.memory_space<vmem>>, vector<256x64xbf16>
    %27 = arith.truncf %25 : vector<64x128xf32> to vector<64x128xbf16>
    %cst_15 = arith.constant dense<0.000000e+00> : vector<256x128xf32>
    %28 = tpu.matmul %26, %27, %cst_15 {dimension_numbers = #tpu.dot_dimension_numbers<[1], [0], [0], [1], [0, 0, 1, 1], [], []>} : vector<256x64xbf16>, vector<64x128xbf16>, vector<256x128xf32> -> vector<256x128xf32>
    %29 = vector.extract_strided_slice %28 {offsets = [0, 0], sizes = [128, 128], strides = [1, 1]} : vector<256x128xf32> to vector<128x128xf32>
    %30 = vector.extract_strided_slice %28 {offsets = [128, 0], sizes = [128, 128], strides = [1, 1]} : vector<256x128xf32> to vector<128x128xf32>
    %31 = arith.maximumf %29, %30 : vector<128x128xf32>
    %c0_16 = arith.constant 0 : index
    %c0_17 = arith.constant 0 : index
    %32 = vector.load %arg8[%c0_16, %c0_17] : memref<128x1xf32, #tpu.memory_space<vmem>>, vector<128x1xf32>
    %33 = vector.broadcast %32 : vector<128x1xf32> to vector<128x128xf32>
    %34 = arith.addf %31, %33 : vector<128x128xf32>
    %cst_18 = arith.constant 0.000000e+00 : f32
    %35 = vector.broadcast %cst_18 : f32 to vector<128x128xf32>
    %36 = arith.maximumf %34, %35 : vector<128x128xf32>
    %c0_19 = arith.constant 0 : index
    %c0_20 = arith.constant 0 : index
    %37 = vector.load %arg9[%c0_19, %c0_20] : memref<16x128xbf16, #tpu.memory_space<vmem>>, vector<16x128xbf16>
    %38 = arith.truncf %36 : vector<128x128xf32> to vector<128x128xbf16>
    %cst_21 = arith.constant dense<0.000000e+00> : vector<16x128xf32>
    %39 = tpu.matmul %37, %38, %cst_21 {dimension_numbers = #tpu.dot_dimension_numbers<[1], [0], [0], [1], [0, 0, 1, 1], [], []>} : vector<16x128xbf16>, vector<128x128xbf16>, vector<16x128xf32> -> vector<16x128xf32>
    %c0_22 = arith.constant 0 : index
    %c0_23 = arith.constant 0 : index
    %40 = vector.load %arg10[%c0_22, %c0_23] : memref<16x1xf32, #tpu.memory_space<vmem>>, vector<16x1xf32>
    %41 = vector.broadcast %40 : vector<16x1xf32> to vector<16x128xf32>
    %42 = arith.addf %39, %41 : vector<16x128xf32>
    %43 = math.absf %42 : vector<16x128xf32>
    %cst_24 = arith.constant 0.000000e+00 : f32
    %44 = vector.broadcast %cst_24 : f32 to vector<16x128xf32>
    %45 = arith.subf %44, %43 : vector<16x128xf32>
    %46 = math.exp %45 : vector<16x128xf32>
    %cst_25 = arith.constant 1.000000e+00 : f32
    %47 = vector.broadcast %cst_25 : f32 to vector<16x128xf32>
    %48 = arith.addf %47, %46 : vector<16x128xf32>
    %49 = tpu.reciprocal %48 {approx = true} : vector<16x128xf32> -> vector<16x128xf32>
    %cst_26 = arith.constant 0.000000e+00 : f32
    %50 = vector.broadcast %cst_26 : f32 to vector<16x128xf32>
    %51 = arith.cmpf oge, %42, %50 : vector<16x128xf32>
    %cst_27 = arith.constant 1.000000e+00 : f32
    %52 = vector.broadcast %cst_27 : f32 to vector<16x128xf32>
    %53 = arith.subf %52, %49 : vector<16x128xf32>
    %54 = arith.select %51, %49, %53 : vector<16x128xi1>, vector<16x128xf32>
    %c0_28 = arith.constant 0 : index
    %c0_29 = arith.constant 0 : index
    %55 = vector.load %arg11[%c0_28, %c0_29] : memref<16x128xf32, #tpu.memory_space<vmem>>, vector<16x128xf32>
    tpu.vector_store %arg11[%c0_28, %c0_29], %54 {strides = array<i32>} : memref<16x128xf32, #tpu.memory_space<vmem>>, vector<16x128xf32>,
    return
  }
  func.func @transform_0(%arg0: i32) -> (i32, i32) {
    %c0_i32 = arith.constant 0 : i32
    %c0_i32_0 = arith.constant 0 : i32
    return %c0_i32, %arg0 : i32, i32
  }
  func.func @transform_1(%arg0: i32) -> (i32, i32) {
    %c0_i32 = arith.constant 0 : i32
    %c0_i32_0 = arith.constant 0 : i32
    %c0_i32_1 = arith.constant 0 : i32
    return %c0_i32, %c0_i32_0 : i32, i32
  }
  func.func @transform_2(%arg0: i32) -> (i32, i32) {
    %c0_i32 = arith.constant 0 : i32
    %c0_i32_0 = arith.constant 0 : i32
    %c0_i32_1 = arith.constant 0 : i32
    return %c0_i32, %c0_i32_0 : i32, i32
  }
  func.func @transform_3(%arg0: i32) -> (i32, i32) {
    %c0_i32 = arith.constant 0 : i32
    %c0_i32_0 = arith.constant 0 : i32
    %c0_i32_1 = arith.constant 0 : i32
    return %c0_i32, %c0_i32_0 : i32, i32
  }
  func.func @transform_4(%arg0: i32) -> (i32, i32) {
    %c0_i32 = arith.constant 0 : i32
    %c0_i32_0 = arith.constant 0 : i32
    %c0_i32_1 = arith.constant 0 : i32
    return %c0_i32, %c0_i32_0 : i32, i32
  }
  func.func @transform_5(%arg0: i32) -> (i32, i32) {
    %c0_i32 = arith.constant 0 : i32
    %c0_i32_0 = arith.constant 0 : i32
    %c0_i32_1 = arith.constant 0 : i32
    return %c0_i32, %c0_i32_0 : i32, i32
  }
  func.func @transform_6(%arg0: i32) -> (i32, i32) {
    %c0_i32 = arith.constant 0 : i32
    %c0_i32_0 = arith.constant 0 : i32
    %c0_i32_1 = arith.constant 0 : i32
    return %c0_i32, %c0_i32_0 : i32, i32
  }
  func.func @transform_7(%arg0: i32) -> (i32, i32) {
    %c0_i32 = arith.constant 0 : i32
    %c0_i32_0 = arith.constant 0 : i32
    %c0_i32_1 = arith.constant 0 : i32
    return %c0_i32, %c0_i32_0 : i32, i32
  }
  func.func @transform_8(%arg0: i32) -> (i32, i32) {
    %c0_i32 = arith.constant 0 : i32
    %c0_i32_0 = arith.constant 0 : i32
    %c0_i32_1 = arith.constant 0 : i32
    return %c0_i32, %c0_i32_0 : i32, i32
  }
  func.func @transform_9(%arg0: i32) -> (i32, i32) {
    %c0_i32 = arith.constant 0 : i32
    %c0_i32_0 = arith.constant 0 : i32
    %c0_i32_1 = arith.constant 0 : i32
    return %c0_i32, %c0_i32_0 : i32, i32
  }
  func.func @transform_10(%arg0: i32) -> (i32, i32) {
    %c0_i32 = arith.constant 0 : i32
    %c0_i32_0 = arith.constant 0 : i32
    return %c0_i32, %arg0 : i32, i32
  }
}

</mosaic_0001>

<bundles_post_ra>
// kernel: tpu_custom_call.1
= control target key start
LH: loop header
LB: loop body
LE: loop exit
PB: predicated region body
PF: predicated region fallthrough
CT: control target
= control target key end

     0   :  { %v1197_v2 = vmov 0   ;;  %vm194_vm0 = vcmask 261120   ;;  %s1519_s0 = inlined_call_operand.vmem [shape: f32[1,128], index: 0, kind: input, shape index: {}]   ;;  %s1520_s1 = inlined_call_operand.vmem [shape: f32[32,1], index: 1, kind: input, shape index: {}]   ;;  %s1521_s2 = inlined_call_operand.vmem [shape: f32[32,1], index: 2, kind: input, shape index: {}]   ;;  %s1522_s3 = inlined_call_operand.vmem [shape: f32[32,1], index: 3, kind: input, shape index: {}]   ;;  %s1523_s4 = inlined_call_operand.vmem [shape: bf16[128,32], index: 4, kind: input, shape index: {}]   ;;  %s1524_s5 = inlined_call_operand.vmem [shape: f32[64,1], index: 5, kind: input, shape index: {}]   ;;  %s1525_s6 = inlined_call_operand.vmem [shape: bf16[256,64], index: 6, kind: input, shape index: {}]   ;;  %s1526_s7 = inlined_call_operand.vmem [shape: f32[128,1], index: 7, kind: input, shape index: {}]   ;;  %s1527_s8 = inlined_call_operand.vmem [shape: bf16[16,128], index: 8, kind: input, shape index: {}]   ;;  %s1528_s9 = inlined_call_operand.vmem [shape: f32[16,1], index: 9, kind: input, shape index: {}]   ;;  %s1529_s10 = inlined_call_operand.hbm [shape: f32[16,128], index: 10, kind: output, shape index: {}]  }
   0x1   :  { %v72_v0 = vld [vmem:[%s1521_s2] sm:$0xff]  ;;  %1139 = vset.pattern.permute.xlu1 %v1197_v2  ;;  %1138 = vset.pattern.permute.xlu0 %v1197_v2  ;;  %v73_v3 = vld [vmem:[%s1521_s2 + $0x8] sm:$0xff]  ;;  %v41_v5 = vld [vmem:[%s1520_s1 + $0x18] sm:$0xff] }
   0x2   :  { %v38_v1 = vld [vmem:[%s1520_s1] sm:$0xff]  ;;  %78 = vperm.xlu1 %1139, %v72_v0   ;;  %v39_v4 = vld [vmem:[%s1520_s1 + $0x8] sm:$0xff]  ;;  %v40_v6 = vld [vmem:[%s1520_s1 + $0x10] sm:$0xff] }
   0x3   :  { %44 = vperm.xlu0 %1138, %v38_v1   ;;  %v75_v7 = vld [vmem:[%s1521_s2 + $0x18] sm:$0xff]  ;;  %v74_v8 = vld [vmem:[%s1521_s2 + $0x10] sm:$0xff]  ;;  %v105_v9 = vld [vmem:[%s1522_s3 + $0x8] sm:$0xff] }
   0x4   :  { %v104_v10 = vld [vmem:[%s1522_s3] sm:$0xff]  ;;  %v107_v11 = vld [vmem:[%s1522_s3 + $0x18] sm:$0xff]  ;;  %v106_v12 = vld [vmem:[%s1522_s3 + $0x10] sm:$0xff] }
   0x5   :  { %v325_v13 = vld [vmem:[%s1524_s5 + $0x8] sm:$0xff]  ;;  %v324_v14 = vld [vmem:[%s1524_s5] sm:$0xff]  ;;  %v327_v15 = vld [vmem:[%s1524_s5 + $0x18] sm:$0xff] }
   0x6   :  { %83 = vperm.xlu1 %1139, %v73_v3   ;;  %v326_v16 = vld [vmem:[%s1524_s5 + $0x10] sm:$0xff]  ;;  %v1140_v17 = vld [vmem:[%s1523_s4] sm:$0xff]  }
   0x7   :  { %49 = vperm.xlu0 %1138, %v39_v4  }
   0xa   :  { %59 = vperm.xlu1 %1139, %v41_v5  }
   0xb   :  { %54 = vperm.xlu0 %1138, %v40_v6  }
   0xe   :  { %93 = vperm.xlu1 %1139, %v75_v7  }
   0xf   :  { %88 = vperm.xlu0 %1138, %v74_v8  }
  0x12   :  { %115 = vperm.xlu1 %1139, %v105_v9  }
  0x13   :  { %110 = vperm.xlu0 %1138, %v104_v10  }
  0x16   :  { %125 = vperm.xlu1 %1139, %v107_v11  }
  0x17   :  { %120 = vperm.xlu0 %1138, %v106_v12  }
  0x1a   :  { %339 = vperm.xlu1 %1139, %v325_v13  }
  0x1b   :  { %334 = vperm.xlu0 %1138, %v324_v14  }
  0x1e   :  { %349 = vperm.xlu1 %1139, %v327_v15  }
  0x1f   :  { %344 = vperm.xlu0 %1138, %v326_v16  }
  0x20   :  { %15 = vsyncpa [#allocation3], 0  ;;  %v329_v18 = vld [vmem:[%s1524_s5 + $0x28] sm:$0xff]  ;;  %v328_v19 = vld [vmem:[%s1524_s5 + $0x20] sm:$0xff]  ;;  %1056 = vmatprep.mubr.msk.bf16.mxu0 %vm194_vm0, %v1140_v17  ;;  %vm504_vm1 = vcmask 523264   ;;  %vm1199_vm2 = vmmov 0  }
  0x21   :  { %v331_v20 = vld [vmem:[%s1524_s5 + $0x38] sm:$0xff]  ;;  %v330_v21 = vld [vmem:[%s1524_s5 + $0x30] sm:$0xff]  ;;  %v731_v22 = vld [vmem:[%s1526_s7 + $0x8] sm:$0xff] }
  0x22   :  { %359 = vperm.xlu1 %1139, %v329_v18   ;;  %v730_v23 = vld [vmem:[%s1526_s7] sm:$0xff]  ;;  %v733_v24 = vld [vmem:[%s1526_s7 + $0x18] sm:$0xff]  ;;  %v732_v25 = vld [vmem:[%s1526_s7 + $0x10] sm:$0xff] }
  0x23   :  { %354 = vperm.xlu0 %1138, %v328_v19   ;;  %v735_v26 = vld [vmem:[%s1526_s7 + $0x28] sm:$0xff]  ;;  %v734_v27 = vld [vmem:[%s1526_s7 + $0x20] sm:$0xff]  ;;  %v737_v28 = vld [vmem:[%s1526_s7 + $0x38] sm:$0xff] }
  0x24   :  { %v736_v29 = vld [vmem:[%s1526_s7 + $0x30] sm:$0xff]  ;;  %v739_v30 = vld [vmem:[%s1526_s7 + $0x48] sm:$0xff]  ;;  %v738_v31 = vld [vmem:[%s1526_s7 + $0x40] sm:$0xff] }
  0x25   :  { %v741_v32 = vld [vmem:[%s1526_s7 + $0x58] sm:$0xff]  ;;  %v740_v33 = vld [vmem:[%s1526_s7 + $0x50] sm:$0xff]  ;;  %v743_v34 = vld [vmem:[%s1526_s7 + $0x68] sm:$0xff] }
  0x26   :  { %369 = vperm.xlu1 %1139, %v331_v20   ;;  %v742_v35 = vld [vmem:[%s1526_s7 + $0x60] sm:$0xff]  ;;  %v745_v36 = vld [vmem:[%s1526_s7 + $0x78] sm:$0xff]  ;;  %v744_v37 = vld [vmem:[%s1526_s7 + $0x70] sm:$0xff] }
  0x27   :  { %364 = vperm.xlu0 %1138, %v330_v21   ;;  %v869_v38 = vld [vmem:[%s1528_s9 + $0x8] sm:$0xff]  ;;  %v868_v39 = vld [vmem:[%s1528_s9] sm:$0xff]  ;;  %v1142_v12 = vld [vmem:[%s1523_s4 + $0x10] sm:$0xff]  }
  0x28   :  { %v963_v44 = vld [vmem:[%s1519_s0] ss:$0 sm:$0xff]  ;;  %v1141_v11 = vld [vmem:[%s1523_s4 + $0x8] sm:$0xff]   ;;  %v1143_v13 = vld [vmem:[%s1523_s4 + $0x18] sm:$0xff]  }
  0x29   :  { %v1144_v14 = vld [vmem:[%s1523_s4 + $0x20] sm:$0xff]   ;;  %v1145_v15 = vld [vmem:[%s1523_s4 + $0x28] sm:$0xff]   ;;  %v1146_v16 = vld [vmem:[%s1523_s4 + $0x30] sm:$0xff]  }
  0x2a   :  { %753 = vperm.xlu1 %1139, %v731_v22   ;;  %v1147_v17 = vld [vmem:[%s1523_s4 + $0x38] sm:$0xff]   ;;  %v1148_v18 = vld [vmem:[%s1525_s6] sm:$0xff]  }
  0x2b   :  { %748 = vperm.xlu0 %1138, %v730_v23   ;;  %1080 = vmatprep.mubr.msk.bf16.mxu1 %vm504_vm1, %v1148_v18  ;;  %v1160_v18 = vld [vmem:[%s1525_s6 + $0x60] sm:$0xff]  }
  0x2e   :  { %763 = vperm.xlu1 %1139, %v733_v24  }
  0x2f   :  { %758 = vperm.xlu0 %1138, %v732_v25  }
  0x32   :  { %773 = vperm.xlu1 %1139, %v735_v26  }
  0x33   :  { %768 = vperm.xlu0 %1138, %v734_v27  }
  0x36   :  { %783 = vperm.xlu1 %1139, %v737_v28  }
  0x37   :  { %778 = vperm.xlu0 %1138, %v736_v29  }
  0x3a   :  { %793 = vperm.xlu1 %1139, %v739_v30  }
  0x3b   :  { %788 = vperm.xlu0 %1138, %v738_v31  }
  0x3e   :  { %803 = vperm.xlu1 %1139, %v741_v32  }
  0x3f   :  { %798 = vperm.xlu0 %1138, %v740_v33  }
  0x42   :  { %813 = vperm.xlu1 %1139, %v743_v34  }
  0x43   :  { %808 = vperm.xlu0 %1138, %v742_v35  }
  0x46   :  { %823 = vperm.xlu1 %1139, %v745_v36  }
  0x47   :  { %818 = vperm.xlu0 %1138, %v744_v37  }
  0x4a   :  { %877 = vperm.xlu1 %1139, %v869_v38  }
  0x4b   :  { %872 = vperm.xlu0 %1138, %v868_v39  }
  0x81   :  { %v79_v40 = vpop.permute.xlu1 %78 }
  0x82   :  { %v45_v41 = vpop.permute.xlu0 %44  ;;  %v96_v47 = vmul.f32 %v963_v44, %v79_v40 }
  0x83   :  { %v68_v48 = vmul.f32 %v963_v44, %v45_v41 }
  0x85   :  { %v84_v42 = vpop.permute.xlu1 %83  ;;  %v100_v56 = vmax.f32 %v68_v48, %v96_v47 }
  0x86   :  { %v50_v43 = vpop.permute.xlu0 %49  ;;  %v97_v49 = vmul.f32 %v963_v44, %v84_v42 }
  0x87   :  { %v69_v50 = vmul.f32 %v963_v44, %v50_v43 }
  0x89   :  { %v60_v45 = vpop.permute.xlu1 %59  ;;  %v101_v55 = vmax.f32 %v69_v50, %v97_v49 }
  0x8a   :  { %v55_v46 = vpop.permute.xlu0 %54  ;;  %v71_v59 = vmul.f32 %v963_v44, %v60_v45 }
  0x8b   :  { %v70_v60 = vmul.f32 %v963_v44, %v55_v46 }
  0x8d   :  { %v94_v51 = vpop.permute.xlu1 %93 }
  0x8e   :  { %v89_v52 = vpop.permute.xlu0 %88  ;;  %v99_v53 = vmul.f32 %v963_v44, %v94_v51 }
  0x8f   :  { %v98_v54 = vmul.f32 %v963_v44, %v89_v52 }
  0x90   :  { %v103_v1 = vmax.f32 %v71_v59, %v99_v53 }
  0x91   :  { %v116_v57 = vpop.permute.xlu1 %115  ;;  %v102_v2 = vmax.f32 %v70_v60, %v98_v54 }
  0x92   :  { %v111_v58 = vpop.permute.xlu0 %110  ;;  %v129_v61 = vadd.f32 %v116_v57, %v101_v55 }
  0x93   :  { %v128_v62 = vadd.f32 %v111_v58, %v100_v56 }
  0x94   :  { %v133_v63 = vmax.f32 %v129_v61, 0.0 }
  0x95   :  { %v132_v0 = vmax.f32 %v128_v62, 0.0  ;;  %v126_v3 = vpop.permute.xlu1 %125 }
  0x96   :  { %v121_v4 = vpop.permute.xlu0 %120  ;;  %v131_v5 = vadd.f32 %v126_v3, %v103_v1 }
  0x97   :  { %v130_v6 = vadd.f32 %v121_v4, %v102_v2  ;;  %v152_v7 = vpack.c.bf16 %v133_v63, %v132_v0 }
  0x98   :  { %v135_v8 = vmax.f32 %v131_v5, 0.0 }
  0x99   :  { %v134_v9 = vmax.f32 %v130_v6, 0.0  ;;  %1052 = vmatprep.subr.bf16.mxu0 %v152_v7  ;;  %v340_v26 = vpop.permute.xlu1 %339 }
  0x9a   :  { %1053 = vmatpush3.bf16.msra.mxu0 %v152_v7  ;;  %v335_v23 = vpop.permute.xlu0 %334  ;;  %v1149_v7 = vld [vmem:[%s1525_s6 + $0x8] sm:$0xff]  }
  0x9b   :  { %v153_v10 = vpack.c.bf16 %v135_v8, %v134_v9  ;;  %v1150_v8 = vld [vmem:[%s1525_s6 + $0x10] sm:$0xff]   ;;  %v1151_v9 = vld [vmem:[%s1525_s6 + $0x18] sm:$0xff]  }
  0x9d   :  { %1054 = vmatprep.subr.bf16.mxu0 %v153_v10  ;;  %v350_v30 = vpop.permute.xlu1 %349 }
  0x9e   :  { %1055 = vmatpush3.bf16.msra.mxu0 %v153_v10  ;;  %v345_v29 = vpop.permute.xlu0 %344  ;;  %v1152_v10 = vld [vmem:[%s1525_s6 + $0x20] sm:$0xff]  }
  0xa1   :  { %1057 = vmatmul.mubr.msk.bf16.vlgmr.msra.gmra.mrb[0].mxu0 %vm194_vm0, %v1141_v11  ;;  %v360_v43 = vpop.permute.xlu1 %359  ;;  %v1153_v11 = vld [vmem:[%s1525_s6 + $0x28] sm:$0xff]  }
  0xa2   :  { %1060 = vmatprep.mubr.msk.bf16.mxu0 %vm194_vm0, %v1142_v12  ;;  %v355_v39 = vpop.permute.xlu0 %354  ;;  %v1154_v12 = vld [vmem:[%s1525_s6 + $0x30] sm:$0xff]  }
  0xa5   :  { %v370_v60 = vpop.permute.xlu1 %369 }
  0xa6   :  { %v365_v53 = vpop.permute.xlu0 %364 }
  0xa9   :  { %1061 = vmatmul.mubr.msk.bf16.gmra.mrb[4].mxu0 %vm194_vm0, %v1143_v13  ;;  %v1155_v13 = vld [vmem:[%s1525_s6 + $0x38] sm:$0xff]  }
  0xaa   :  { %1064 = vmatprep.mubr.msk.bf16.mxu0 %vm194_vm0, %v1144_v14  ;;  %v1156_v14 = vld [vmem:[%s1525_s6 + $0x40] sm:$0xff]  }
  0xb1   :  { %1065 = vmatmul.mubr.msk.bf16.gmra.mrb[8].mxu0 %vm194_vm0, %v1145_v15  ;;  %v1157_v15 = vld [vmem:[%s1525_s6 + $0x48] sm:$0xff]  }
  0xb2   :  { %1068 = vmatprep.mubr.msk.bf16.mxu0 %vm194_vm0, %v1146_v16  ;;  %v1158_v16 = vld [vmem:[%s1525_s6 + $0x50] sm:$0xff]  }
  0xb9   :  { %1069 = vmatmul.mubr.msk.bf16.gmra.mrb[12].mxu0 %vm194_vm0, %v1147_v17  ;;  %v1159_v17 = vld [vmem:[%s1525_s6 + $0x58] sm:$0xff]  }
 0x174   :  { %v1058_v19 = vpop.f32.mrb[0].mxu0 }
 0x175   :  { %v253_v20 = vpop.f32.mrb[1].mxu0 }
 0x176   :  { %v1059_v21 = vpop.f32.mrb[2].mxu0 }
 0x177   :  { %v256_v22 = vpop.f32.mrb[3].mxu0 }
 0x17c   :  { %v1062_v24 = vpop.f32.mrb[4].mxu0 }
 0x17d   :  { %v269_v25 = vpop.f32.mrb[5].mxu0 }
 0x17e   :  { %v1063_v27 = vpop.f32.mrb[6].mxu0 }
 0x17f   :  { %v272_v28 = vpop.f32.mrb[7].mxu0 }
 0x184   :  { %v1066_v31 = vpop.f32.mrb[8].mxu0 }
 0x185   :  { %v318_v32 = vmax.f32 %v1058_v19, %v1066_v31  ;;  %v285_v33 = vpop.f32.mrb[9].mxu0  ;;  %v1161_v19 = vld [vmem:[%s1525_s6 + $0x68] sm:$0xff]   ;;  %v749_v31 = vpop.permute.xlu0 %748 }
 0x186   :  { %v316_v34 = vmax.f32 %v253_v20, %v285_v33  ;;  %v1067_v35 = vpop.f32.mrb[10].mxu0  ;;  %v1162_v20 = vld [vmem:[%s1525_s6 + $0x70] sm:$0xff]  }
 0x187   :  { %v374_v36 = vadd.f32 %v345_v29, %v318_v32  ;;  %v319_v37 = vmax.f32 %v1059_v21, %v1067_v35  ;;  %v288_v38 = vpop.f32.mrb[11].mxu0  ;;  %v1163_v21 = vld [vmem:[%s1525_s6 + $0x78] sm:$0xff]  }
 0x188   :  { %v372_v40 = vadd.f32 %v335_v23, %v316_v34  ;;  %v317_v41 = vmax.f32 %v256_v22, %v288_v38  ;;  %v1198_v22 = vmov 0.0   ;;  %v754_v34 = vpop.permute.xlu1 %753 }
 0x189   :  { %v375_v42 = vadd.f32 %v350_v30, %v319_v37  ;;  %v382_v45 = vmax.f32 %v374_v36, 0.0  ;;  %1112 = vmatprep.subr.bf16.mxu0 %v1198_v22  ;;  %1128 = vmatprep.mubr.msk.bf16.mxu0 %vm1199_vm2, %v1198_v22  ;;  %v759_v37 = vpop.permute.xlu0 %758 }
 0x18a   :  { %v373_v44 = vadd.f32 %v340_v26, %v317_v41  ;;  %v380_v47 = vmax.f32 %v372_v40, 0.0 }
 0x18b   :  { %v383_v46 = vmax.f32 %v375_v42, 0.0 }
 0x18c   :  { %v381_v48 = vmax.f32 %v373_v44, 0.0  ;;  %v1070_v49 = vpop.f32.mrb[12].mxu0  ;;  %v764_v38 = vpop.permute.xlu1 %763 }
 0x18d   :  { %v322_v50 = vmax.f32 %v1062_v24, %v1070_v49  ;;  %v301_v51 = vpop.f32.mrb[13].mxu0  ;;  %v421_v52 = vpack.c.bf16 %v383_v46, %v382_v45 }
 0x18e   :  { %v320_v54 = vmax.f32 %v269_v25, %v301_v51  ;;  %v1071_v55 = vpop.f32.mrb[14].mxu0  ;;  %v420_v56 = vpack.c.bf16 %v381_v48, %v380_v47 }
 0x18f   :  { %v378_v57 = vadd.f32 %v365_v53, %v322_v50  ;;  %v323_v58 = vmax.f32 %v1063_v27, %v1071_v55  ;;  %v304_v59 = vpop.f32.mrb[15].mxu0 }
 0x190   :  { %v376_v61 = vadd.f32 %v355_v39, %v320_v54  ;;  %v321_v62 = vmax.f32 %v272_v28, %v304_v59  ;;  %1072 = vmatprep.subr.bf16.mxu1 %v420_v56  ;;  %v774_v44 = vpop.permute.xlu1 %773 }
 0x191   :  { %v379_v63 = vadd.f32 %v370_v60, %v323_v58  ;;  %1073 = vmatpush3.bf16.msra.mxu1 %v420_v56  ;;  %v386_v1 = vmax.f32 %v378_v57, 0.0 }
 0x192   :  { %v377_v0 = vadd.f32 %v360_v43, %v321_v62  ;;  %1074 = vmatprep.subr.bf16.mxu1 %v421_v52  ;;  %v384_v3 = vmax.f32 %v376_v61, 0.0  ;;  %v769_v43 = vpop.permute.xlu0 %768 }
 0x193   :  { %v387_v2 = vmax.f32 %v379_v63, 0.0 }
 0x194   :  { %v385_v4 = vmax.f32 %v377_v0, 0.0  ;;  %v784_v54 = vpop.permute.xlu1 %783 }
 0x195   :  { %1075 = vmatpush3.bf16.msra.mxu1 %v421_v52  ;;  %v423_v5 = vpack.c.bf16 %v387_v2, %v386_v1 }
 0x196   :  { %v422_v6 = vpack.c.bf16 %v385_v4, %v384_v3  ;;  %v779_v48 = vpop.permute.xlu0 %778 }
 0x198   :  { %1076 = vmatprep.subr.bf16.mxu1 %v422_v6  ;;  %v794_v4 = vpop.permute.xlu1 %793 }
 0x199   :  { %1077 = vmatpush3.bf16.msra.mxu1 %v422_v6 }
 0x19a   :  { %1078 = vmatprep.subr.bf16.mxu1 %v423_v5  ;;  %v789_v61 = vpop.permute.xlu0 %788 }
 0x19d   :  { %1079 = vmatpush3.bf16.msra.mxu1 %v423_v5 }
 0x1a0   :  { %1081 = vmatmul.mubr.msk.bf16.vlgmr.msra.gmra.mrb[0].mxu1 %vm504_vm1, %v1149_v7 }
 0x1a1   :  { %1084 = vmatprep.mubr.msk.bf16.mxu1 %vm504_vm1, %v1150_v8 }
 0x1a8   :  { %1085 = vmatmul.mubr.msk.bf16.gmra.mrb[4].mxu1 %vm504_vm1, %v1151_v9 }
 0x1a9   :  { %1088 = vmatprep.mubr.msk.bf16.mxu1 %vm504_vm1, %v1152_v10 }
 0x1b0   :  { %1089 = vmatmul.mubr.msk.bf16.gmra.mrb[8].mxu1 %vm504_vm1, %v1153_v11 }
 0x1b1   :  { %1092 = vmatprep.mubr.msk.bf16.mxu1 %vm504_vm1, %v1154_v12 }
 0x1b8   :  { %1093 = vmatmul.mubr.msk.bf16.gmra.mrb[12].mxu1 %vm504_vm1, %v1155_v13 }
 0x1b9   :  { %1096 = vmatprep.mubr.msk.bf16.mxu1 %vm504_vm1, %v1156_v14  ;;  %v799_v14 = vpop.permute.xlu0 %798 }
 0x1c0   :  { %1097 = vmatmul.mubr.msk.bf16.gmra.mrb[16].mxu1 %vm504_vm1, %v1157_v15 }
 0x1c1   :  { %1100 = vmatprep.mubr.msk.bf16.mxu1 %vm504_vm1, %v1158_v16 }
 0x1c8   :  { %1101 = vmatmul.mubr.msk.bf16.gmra.mrb[20].mxu1 %vm504_vm1, %v1159_v17 }
 0x1c9   :  { %1104 = vmatprep.mubr.msk.bf16.mxu1 %vm504_vm1, %v1160_v18  ;;  %v804_v18 = vpop.permute.xlu1 %803 }
 0x1d0   :  { %1105 = vmatmul.mubr.msk.bf16.gmra.mrb[24].mxu1 %vm504_vm1, %v1161_v19 }
 0x1d1   :  { %1108 = vmatprep.mubr.msk.bf16.mxu1 %vm504_vm1, %v1162_v20 }
 0x1d8   :  { %1109 = vmatmul.mubr.msk.bf16.gmra.mrb[28].mxu1 %vm504_vm1, %v1163_v21 }
 0x273   :  { %v1082_v23 = vpop.f32.mrb[0].mxu1 }
 0x274   :  { %v587_v24 = vpop.f32.mrb[1].mxu1 }
 0x275   :  { %v1083_v25 = vpop.f32.mrb[2].mxu1 }
 0x276   :  { %v590_v26 = vpop.f32.mrb[3].mxu1 }
 0x27b   :  { %v1086_v27 = vpop.f32.mrb[4].mxu1 }
 0x27c   :  { %v603_v28 = vpop.f32.mrb[5].mxu1 }
 0x27d   :  { %v1087_v29 = vpop.f32.mrb[6].mxu1 }
 0x27e   :  { %v606_v30 = vpop.f32.mrb[7].mxu1 }
 0x283   :  { %v1473_v32 = vpop.f32.mrb[8].mxu1 }
 0x284   :  { %v1475_v33 = vpop.f32.mrb[9].mxu1 }
 0x285   :  { %v1477_v35 = vpop.f32.mrb[10].mxu1 }
 0x286   :  { %v1479_v36 = vpop.f32.mrb[11].mxu1 }
 0x28b   :  { %v1481_v39 = vpop.f32.mrb[12].mxu1 }
 0x28c   :  { %v1483_v40 = vpop.f32.mrb[13].mxu1 }
 0x28d   :  { %v1485_v41 = vpop.f32.mrb[14].mxu1 }
 0x28e   :  { %v1487_v42 = vpop.f32.mrb[15].mxu1 }
 0x293   :  { %v1098_v45 = vpop.f32.mrb[16].mxu1 }
 0x294   :  { %v716_v46 = vmax.f32 %v1082_v23, %v1098_v45  ;;  %v651_v47 = vpop.f32.mrb[17].mxu1 }
 0x295   :  { %v714_v49 = vmax.f32 %v587_v24, %v651_v47  ;;  %v1099_v50 = vpop.f32.mrb[18].mxu1 }
 0x296   :  { %v828_v51 = vadd.f32 %v759_v37, %v716_v46  ;;  %v717_v52 = vmax.f32 %v1083_v25, %v1099_v50  ;;  %v654_v53 = vpop.f32.mrb[19].mxu1 }
 0x297   :  { %v826_v55 = vadd.f32 %v749_v31, %v714_v49  ;;  %v715_v56 = vmax.f32 %v590_v26, %v654_v53 }
 0x298   :  { %v829_v57 = vadd.f32 %v764_v38, %v717_v52  ;;  %v844_v59 = vmax.f32 %v828_v51, 0.0 }
 0x299   :  { %v827_v58 = vadd.f32 %v754_v34, %v715_v56  ;;  %v842_v62 = vmax.f32 %v826_v55, 0.0  ;;  %v809_v34 = vpop.permute.xlu0 %808 }
 0x29a   :  { %v845_v60 = vmax.f32 %v829_v57, 0.0 }
 0x29b   :  { %v843_v63 = vmax.f32 %v827_v58, 0.0  ;;  %v1102_v0 = vpop.f32.mrb[20].mxu1 }
 0x29c   :  { %v861_v1 = vpack.c.bf16 %v845_v60, %v844_v59  ;;  %v720_v2 = vmax.f32 %v1086_v27, %v1102_v0  ;;  %v667_v3 = vpop.f32.mrb[21].mxu1 }
 0x29d   :  { %v860_v5 = vpack.c.bf16 %v843_v63, %v842_v62  ;;  %v718_v6 = vmax.f32 %v603_v28, %v667_v3  ;;  %v1103_v7 = vpop.f32.mrb[22].mxu1  ;;  %v819_v51 = vpop.permute.xlu0 %818 }
 0x29e   :  { %v832_v8 = vadd.f32 %v779_v48, %v720_v2  ;;  %v721_v9 = vmax.f32 %v1087_v29, %v1103_v7  ;;  %v670_v10 = vpop.f32.mrb[23].mxu1 }
 0x29f   :  { %v830_v11 = vadd.f32 %v769_v43, %v718_v6  ;;  %v719_v12 = vmax.f32 %v606_v30, %v670_v10  ;;  %1113 = vmatpush3.bf16.msra.mxu0 %v860_v5 }
 0x2a0   :  { %v833_v13 = vadd.f32 %v784_v54, %v721_v9  ;;  %1114 = vmatprep.subr.bf16.mxu0 %v1198_v22  ;;  %v848_v16 = vmax.f32 %v832_v8, 0.0 }
 0x2a1   :  { %v831_v15 = vadd.f32 %v774_v44, %v719_v12  ;;  %v846_v19 = vmax.f32 %v830_v11, 0.0 }
 0x2a2   :  { %v849_v17 = vmax.f32 %v833_v13, 0.0 }
 0x2a3   :  { %v847_v20 = vmax.f32 %v831_v15, 0.0  ;;  %v1106_v21 = vpop.f32.mrb[24].mxu1  ;;  %1115 = vmatpush3.bf16.msra.mxu0 %v861_v1 }
 0x2a4   :  { %v863_v23 = vpack.c.bf16 %v849_v17, %v848_v16  ;;  %v724_v24 = vmax.f32 %v1473_v32, %v1106_v21  ;;  %v683_v25 = vpop.f32.mrb[25].mxu1  ;;  %1116 = vmatprep.subr.bf16.mxu0 %v1198_v22  ;;  %v814_v32 = vpop.permute.xlu1 %813 }
 0x2a5   :  { %v862_v26 = vpack.c.bf16 %v847_v20, %v846_v19  ;;  %v722_v27 = vmax.f32 %v1475_v33, %v683_v25  ;;  %v1107_v28 = vpop.f32.mrb[26].mxu1 }
 0x2a6   :  { %v836_v29 = vadd.f32 %v799_v14, %v724_v24  ;;  %v725_v30 = vmax.f32 %v1477_v35, %v1107_v28  ;;  %v686_v31 = vpop.f32.mrb[27].mxu1 }
 0x2a7   :  { %v834_v37 = vadd.f32 %v789_v61, %v722_v27  ;;  %v723_v38 = vmax.f32 %v1479_v36, %v686_v31  ;;  %1117 = vmatpush3.bf16.msra.mxu0 %v862_v26 }
 0x2a8   :  { %v837_v43 = vadd.f32 %v804_v18, %v725_v30  ;;  %1118 = vmatprep.subr.bf16.mxu0 %v1198_v22  ;;  %v852_v45 = vmax.f32 %v836_v29, 0.0  ;;  %v824_v57 = vpop.permute.xlu1 %823 }
 0x2a9   :  { %v835_v44 = vadd.f32 %v794_v4, %v723_v38  ;;  %v850_v47 = vmax.f32 %v834_v37, 0.0 }
 0x2aa   :  { %v853_v46 = vmax.f32 %v837_v43, 0.0 }
 0x2ab   :  { %v851_v48 = vmax.f32 %v835_v44, 0.0  ;;  %v1110_v33 = vpop.f32.mrb[28].mxu1  ;;  %1119 = vmatpush3.bf16.msra.mxu0 %v863_v23 }
 0x2ac   :  { %v865_v49 = vpack.c.bf16 %v853_v46, %v852_v45  ;;  %v728_v35 = vmax.f32 %v1481_v39, %v1110_v33  ;;  %v699_v50 = vpop.f32.mrb[29].mxu1  ;;  %1120 = vmatprep.subr.bf16.mxu0 %v1198_v22  ;;  %v878_v5 = vpop.permute.xlu1 %877 }
 0x2ad   :  { %v864_v36 = vpack.c.bf16 %v851_v48, %v850_v47  ;;  %v726_v52 = vmax.f32 %v1483_v40, %v699_v50  ;;  %v1111_v53 = vpop.f32.mrb[30].mxu1 }
 0x2ae   :  { %v840_v54 = vadd.f32 %v819_v51, %v728_v35  ;;  %v729_v55 = vmax.f32 %v1485_v41, %v1111_v53  ;;  %v702_v56 = vpop.f32.mrb[31].mxu1  ;;  %v1164_v41 = vld [vmem:[%s1527_s8] sm:$0xff]   ;;  %s1200_s8 = smov [#allocation2]  }
 0x2af   :  { %v838_v58 = vadd.f32 %v809_v34, %v726_v52  ;;  %v727_v59 = vmax.f32 %v1487_v42, %v702_v56  ;;  %1121 = vmatpush3.bf16.msra.mxu0 %v864_v36  ;;  %v873_v42 = vpop.permute.xlu0 %872  ;;  %s952_s2 = sshll.u32 %s1200_s8, 4  ;;  %s953_s2 = int_to_ptr.vmem [resolvable:$true] %s952_s2 }
 0x2b0   :  { %v841_v60 = vadd.f32 %v824_v57, %v729_v55  ;;  %1122 = vmatprep.subr.bf16.mxu0 %v1198_v22  ;;  %v856_v61 = vmax.f32 %v840_v54, 0.0  ;;  %s1173_s16 = scalar_lea.vmem %s953_s2, 256  ;;  %p1178_p1 = scmp.lt.s32.totalorder %s953_s2, %s953_s2 }
 0x2b1   :  { %v839_v39 = vadd.f32 %v814_v32, %v727_v59  ;;  %v854_v63 = vmax.f32 %v838_v58, 0.0  ;;  %p1174_p0 = scmp.ne.s32.totalorder %s953_s2, %s1173_s16  ;;  %p1179_p2 = scmp.lt.s32.totalorder %s1173_s16, %s1173_s16 }
 0x2b2   :  { %v857_v62 = vmax.f32 %v841_v60, 0.0 }
 0x2b3   :  { %v855_v0 = vmax.f32 %v839_v39, 0.0  ;;  %1123 = vmatpush3.bf16.msra.mxu0 %v865_v49  ;;  %p1180_p3 = por %p1179_p2, %p1178_p1 }
 0x2b4   :  { %v867_v40 = vpack.c.bf16 %v857_v62, %v856_v61  ;;  %1124 = vmatprep.subr.bf16.mxu0 %v1198_v22 }
 0x2b5   :  { %v866_v1 = vpack.c.bf16 %v855_v0, %v854_v63  ;;  %p1181_p4 = pnand %p1180_p3, %p1174_p0 }
 0x2b7   :  { %1125 = vmatpush3.bf16.msra.mxu0 %v866_v1 }
 0x2b8   :  { %1126 = vmatprep.subr.bf16.mxu0 %v1198_v22 }
 0x2bb   :  { %1127 = vmatpush3.bf16.msra.mxu0 %v867_v40 }
 0x2be   :  { %1129 = vmatmul.mubr.bf16.vlgmr.msra.gmra.mrb[16].mxu0 %v1164_v41 }
 0x391   :  { %v920_v2 = vpop.f32.mrb[16].mxu0 }
 0x392   :  { %v921_v3 = vadd.f32 %v920_v2, %v873_v42  ;;  %v1130_v4 = vpop.f32.mrb[17].mxu0 }
 0x393   :  { %v923_v6 = vpop.f32.mrb[18].mxu0 }
 0x394   :  { %v927_v7 = vand.u32 2147483647, %v921_v3  ;;  %v924_v8 = vadd.f32 %v923_v6, %v878_v5  ;;  %v1131_v9 = vpop.f32.mrb[19].mxu0  ;;  %vm939_vm3 = vcmp.ge.f32.partialorder %v921_v3, 0.0 }
 0x396   :  { %v929_v10 = vsub.f32 0.0, %v927_v7  ;;  %v928_v11 = vand.u32 2147483647, %v924_v8  ;;  %vm940_vm4 = vcmp.ge.f32.partialorder %v924_v8, 0.0 }
 0x398   :  { %v931_v12 = vmul.f32 1.442695, %v929_v10  ;;  %v930_v13 = vsub.f32 0.0, %v928_v11 }
 0x39a   :  { %1165 = vpow2.f32 %v931_v12  ;;  %v933_v22 = vmul.f32 1.442695, %v930_v13 }
 0x39c   :  { %1167 = vpow2.f32 %v933_v22 }
 0x3a4   :  { %v1166_v14 = vpop.eup %1165 }
 0x3a5   :  { %v935_v15 = vadd.f32 1.0, %v1166_v14 }
 0x3a6   :  { %v1168_v16 = vpop.eup %1167 }
 0x3a7   :  { %1169 = vrcp.f32 %v935_v15  ;;  %v936_v17 = vadd.f32 1.0, %v1168_v16 }
 0x3a9   :  { %1171 = vrcp.f32 %v936_v17 }
 0x3b1   :  { %v1170_v18 = vpop.eup %1169 }
 0x3b2   :  { %v941_v19 = vsub.f32 1.0, %v1170_v18 }
 0x3b3   :  { %v1172_v20 = vpop.eup %1171 }
 0x3b4   :  { %v943_v21 = vsel %vm939_vm3, %v1170_v18, %v941_v19  ;;  %v942_v23 = vsub.f32 1.0, %v1172_v20 }
 0x3b5   :  { %945 = vst [vmem:[#allocation2] sm:$0xff] %v943_v21 }
 0x3b6   :  { %v944_v24 = vsel %vm940_vm4, %v1172_v20, %v942_v23 }
 0x3b7   :  { %946 = vst [vmem:[#allocation2 + $0x8] sm:$0xff] %v944_v24 }
 0x3b8   :  { %1184 = shalt.err (!%p1181_p4)
}
 0x3b9   :  { %s1185_s18 = scalar_lea.hbm %s1529_s10, 256 }
 0x3ba   :  { %p1186_p5 = scmp.ne.s32.totalorder %s1529_s10, %s1185_s18  ;;  %p1189_p6 = scmp.lt.u32.totalorder %s1185_s18, %s1529_s10 }
 0x3bc   :  { %p1191_p7 = pnand %p1189_p6, %p1186_p5 }
 0x3be   :  { %1194 = shalt.err (!%p1191_p7)
}
 0x3bf   :  { %s1201_s0 = smov 128   ;;  %s1202_s7 = smov 8  }
 0x3c0   :  { %958 = dma.vmem_to_hbm [thread:$0]  %s953_s2, 256, %s1529_s10, [#allocation3], %s1201_s0, %s1201_s0, %s1202_s7  }
 0x3c1   :  { %1195 = dma.done.wait [#allocation3], 256  }
 0x3c2   :  { %1196 = vsyncadd [#allocation3], 4294967040 }
 0x3c3   :  { %962 = vsyncpa [#allocation3], 1 }

</bundles_post_ra>
